<compile_context>
chip_gen: v7x
topology: tpu7x:2x2x1
jax: 0.10.0
libtpu: 0.0.40
codegen_flags: <defaults>
</compile_context>

<pallas_src>
import functools

import jax
import jax.numpy as jnp
from jax.experimental import pallas as pl
from jax.experimental.pallas import tpu as pltpu


def _round_up(x, m):
    return ((x + m - 1) // m) * m


def _sage_kernel_streamed(adj_ref, hw_ref, o_ref, *, apply_relu):
    # adj_ref: (TILE_N, TILE_K)   adjacency block (rows i, neighbor cols k)
    # hw_ref : (TILE_K, D_OUT_P)  streamed block of precomputed h @ W^T
    # o_ref  : (TILE_N, D_OUT_P)  f32 output tile, resident across k (accumulator)
    k = pl.program_id(1)

    @pl.when(k == 0)
    def _():
        o_ref[...] = jnp.zeros_like(o_ref)

    o_ref[...] += jnp.dot(adj_ref[...], hw_ref[...],
                          preferred_element_type=jnp.float32)

    if apply_relu:
        @pl.when(k == pl.num_programs(1) - 1)
        def _():
            o_ref[...] = jnp.maximum(o_ref[...], 0.0)


def _sage_kernel_resident(adj_ref, hw_ref, o_ref, *, tile_k, apply_relu):
    # Same as above, but hw_ref holds the full (N_P, D_OUT_P) array. Its
    # index_map is constant, so it is DMA'd into VMEM exactly once; slice the
    # k-th row block in-kernel.
    k = pl.program_id(1)

    @pl.when(k == 0)
    def _():
        o_ref[...] = jnp.zeros_like(o_ref)

    start = pl.multiple_of(k * tile_k, tile_k)
    o_ref[...] += jnp.dot(adj_ref[...], hw_ref[pl.ds(start, tile_k), :],
                          preferred_element_type=jnp.float32)

    if apply_relu:
        @pl.when(k == pl.num_programs(1) - 1)
        def _():
            o_ref[...] = jnp.maximum(o_ref[...], 0.0)


def _choose_tiles(n_rows, n_cols, row_cap, col_cap, min_row_tiles=2):
    """Pick (tile_n, tile_k) and padded extents.

    tile_n is a sublane dim (multiple of 8); tile_k is adj's lane dim (multiple
    of 128). Guarantees >= min_row_tiles row tiles when possible so the
    "parallel" row axis shards across v7x's two TensorCores.
    """
    tile_n = min(row_cap, _round_up(n_rows, 8))
    if -(-n_rows // tile_n) < min_row_tiles:
        tile_n = max(8, _round_up(-(-n_rows // min_row_tiles), 8))
    n_rows_p = _round_up(n_rows, tile_n)

    tile_k = min(col_cap, _round_up(n_cols, 128))
    n_cols_p = _round_up(n_cols, tile_k)
    return tile_n, tile_k, n_rows_p, n_cols_p


@functools.partial(
    jax.jit, static_argnames=("tile_n", "tile_k", "apply_relu", "hw_resident")
)
def sage_layer(adj, h, w, *, tile_n=None, tile_k=None, apply_relu=True,
               hw_resident=None):
    """GraphSAGE (gcn aggregator) forward: activation(adj @ h @ W^T).

    adj: (N, N) row-normalized adjacency. For bandwidth-bound large graphs,
         materialize adj in bf16 *upstream*; the kernel streams it as-is with
         f32 accumulation.
    h:   (N, d_in) node features.   w: (d_out, d_in) nn.Linear weight.
    """
    # TODO(synk): dropout (training mode) not implemented -- eval-mode forward.
    N = adj.shape[0]
    d_out, d_in = w.shape
    assert adj.shape == (N, N) and h.shape == (N, d_in)

    # Lane-pad the weight so hw = h @ W^T comes out lane-dense directly.
    d_out_p = _round_up(max(d_out, 128), 128)
    if d_out_p != d_out:
        w = jnp.pad(w, ((0, d_out_p - d_out), (0, 0)))
    hw = jnp.dot(h, w.T)                 # (N, d_out_p): tiny matmul, left to XLA
    if hw.dtype != adj.dtype:            # match MXU operand dtypes to adj stream
        hw = hw.astype(adj.dtype)
    # TODO(synk): fp8 (e4m3) adj streaming path for v7x not implemented.

    row_cap = _round_up(tile_n, 8) if tile_n else 512
    col_cap = _round_up(tile_k, 128) if tile_k else 1024
    tn, tk, n_rows_p, n_cols_p = _choose_tiles(N, N, row_cap, col_cap)

    if (n_rows_p, n_cols_p) != (N, N):
        adj = jnp.pad(adj, ((0, n_rows_p - N), (0, n_cols_p - N)))
    if n_cols_p != N:
        hw = jnp.pad(hw, ((0, n_cols_p - N), (0, 0)))

    # Keep hw fully VMEM-resident (single DMA total) when small; else stream.
    itemsize = jnp.dtype(hw.dtype).itemsize
    if hw_resident is None:
        hw_resident = 2 * n_cols_p * d_out_p * itemsize <= 8 * 1024 * 1024

    if hw_resident:
        kernel = functools.partial(_sage_kernel_resident, tile_k=tk,
                                   apply_relu=apply_relu)
        hw_spec = pl.BlockSpec((n_cols_p, d_out_p), lambda i, k: (0, 0))
    else:
        kernel = functools.partial(_sage_kernel_streamed, apply_relu=apply_relu)
        hw_spec = pl.BlockSpec((tk, d_out_p), lambda i, k: (k, 0))

    out = pl.pallas_call(
        kernel,
        out_shape=jax.ShapeDtypeStruct((n_rows_p, d_out_p), jnp.float32),
        grid_spec=pltpu.PrefetchScalarGridSpec(
            num_scalar_prefetch=0,
            grid=(n_rows_p // tn, n_cols_p // tk),
            in_specs=[
                pl.BlockSpec((tn, tk), lambda i, k: (i, k)),   # adj block
                hw_spec,                                       # h @ W^T
            ],
            out_specs=pl.BlockSpec((tn, d_out_p), lambda i, k: (i, 0)),
        ),
        compiler_params=pltpu.CompilerParams(
            dimension_semantics=("parallel", "arbitrary"),
        ),
    )(adj, hw)

    out = out[:N, :d_out]
    return out.astype(h.dtype) if out.dtype != h.dtype else out


def xavier_uniform(key, shape, dtype=jnp.float32):
    fan_out, fan_in = shape
    limit = jnp.sqrt(6.0 / (fan_in + fan_out))
    return jax.random.uniform(key, shape, dtype, minval=-limit, maxval=limit)


def _make_inputs(key, n, d_in, d_out):
    k_adj, k_h, k_w = jax.random.split(key, 3)
    adj_raw = (jax.random.uniform(k_adj, (n, n)) < 0.1).astype(jnp.float32)
    adj_raw = adj_raw + jnp.eye(n, dtype=jnp.float32)
    adj = adj_raw / jnp.sum(adj_raw, axis=1, keepdims=True)  # gcn row-normalized
    h = jax.random.normal(k_h, (n, d_in), dtype=jnp.float32)
    w = xavier_uniform(k_w, (d_out, d_in))                   # nn.Linear weight
    return adj, h, w


if __name__ == "__main__":
    key = jax.random.PRNGKey(0)
    k1, k2 = jax.random.split(key)

    # Case 1: aligned shapes; hw kept VMEM-resident (auto), 2 row tiles.
    adj, h, w = _make_inputs(k1, 128, 32, 32)
    out = jax.block_until_ready(sage_layer(adj, h, w))
    ref = jnp.maximum((adj @ h) @ w.T, 0.0)
    assert out.shape == ref.shape
    assert jnp.allclose(out, ref, atol=1e-4, rtol=1e-4), "mismatch (resident)"

    # Case 2: non-aligned N + d_out (exercises padding) with streamed-hw path.
    adj2, h2, w2 = _make_inputs(k2, 200, 32, 48)
    out2 = jax.block_until_ready(sage_layer(adj2, h2, w2, hw_resident=False))
    ref2 = jnp.maximum((adj2 @ h2) @ w2.T, 0.0)
    assert out2.shape == ref2.shape
    assert jnp.allclose(out2, ref2, atol=1e-4, rtol=1e-4), "mismatch (streamed)"

    print("KERNEL_OK")
</pallas_src>

<mosaic_0001>
module attributes {stable_mosaic.version = 11 : i64} {
  func.func @_sage_kernel_resident(%arg0: i32, %arg1: i32, %arg2: memref<64x128xf32, #tpu.memory_space<vmem>>, %arg3: memref<128x128xf32, #tpu.memory_space<vmem>>, %arg4: memref<64x128xf32, #tpu.memory_space<vmem>>) attributes {dimension_semantics = [#tpu.dimension_semantics<parallel>, #tpu.dimension_semantics<arbitrary>], iteration_bounds = array<i64: 2, 1>, scalar_prefetch = 0 : i64, scratch_operands = 0 : i64, tpu.core_type = #tpu.core_type<tc>, window_params = [{transform_indices = @transform_0, window_bounds = array<i64: 64, 128>}, {pipeline_mode = #tpu.pipeline_mode<synchronous>, transform_indices = @transform_1, window_bounds = array<i64: 128, 128>}, {transform_indices = @transform_2, window_bounds = array<i64: 64, 128>}]} {
    %c0_i32 = arith.constant 0 : i32
    %0 = arith.cmpi eq, %arg1, %c0_i32 : i32
    %1 = arith.extui %0 : i1 to i32
    %c0_i32_0 = arith.constant 0 : i32
    %2 = arith.cmpi ne, %1, %c0_i32_0 : i32
    scf.if %2 {
      %cst_9 = arith.constant 0.000000e+00 : f32
      %15 = vector.broadcast %cst_9 : f32 to vector<64x128xf32>
      %c0_10 = arith.constant 0 : index
      %c0_11 = arith.constant 0 : index
      %16 = vector.load %arg4[%c0_10, %c0_11] : memref<64x128xf32, #tpu.memory_space<vmem>>, vector<64x128xf32>
      tpu.vector_store %arg4[%c0_10, %c0_11], %15 {strides = array<i32>} : memref<64x128xf32, #tpu.memory_space<vmem>>, vector<64x128xf32>,
    } else {
    }
    %c128_i32 = arith.constant 128 : i32
    %3 = arith.muli %arg1, %c128_i32 : i32
    %4 = tpu.assume_multiple %3, 128 : i32
    %c0 = arith.constant 0 : index
    %c0_1 = arith.constant 0 : index
    %5 = vector.load %arg4[%c0, %c0_1] : memref<64x128xf32, #tpu.memory_space<vmem>>, vector<64x128xf32>
    %c0_2 = arith.constant 0 : index
    %c0_3 = arith.constant 0 : index
    %6 = vector.load %arg2[%c0_2, %c0_3] : memref<64x128xf32, #tpu.memory_space<vmem>>, vector<64x128xf32>
    %7 = arith.index_cast %4 : i32 to index
    %c0_4 = arith.constant 0 : index
    %8 = vector.load %arg3[%7, %c0_4] : memref<128x128xf32, #tpu.memory_space<vmem>>, vector<128x128xf32>
    %cst = arith.constant dense<0.000000e+00> : vector<64x128xf32>
    %9 = tpu.matmul %6, %8, %cst {dimension_numbers = #tpu.dot_dimension_numbers<[1], [0], [0], [1], [0, 0, 1, 1], [], []>} : vector<64x128xf32>, vector<128x128xf32>, vector<64x128xf32> -> vector<64x128xf32>
    %10 = arith.addf %5, %9 : vector<64x128xf32>
    %c0_5 = arith.constant 0 : index
    %c0_6 = arith.constant 0 : index
    %11 = vector.load %arg4[%c0_5, %c0_6] : memref<64x128xf32, #tpu.memory_space<vmem>>, vector<64x128xf32>
    tpu.vector_store %arg4[%c0_5, %c0_6], %10 {strides = array<i32>} : memref<64x128xf32, #tpu.memory_space<vmem>>, vector<64x128xf32>,
    %c0_i32_7 = arith.constant 0 : i32
    %12 = arith.cmpi eq, %arg1, %c0_i32_7 : i32
    %13 = arith.extui %12 : i1 to i32
    %c0_i32_8 = arith.constant 0 : i32
    %14 = arith.cmpi ne, %13, %c0_i32_8 : i32
    scf.if %14 {
      %c0_9 = arith.constant 0 : index
      %c0_10 = arith.constant 0 : index
      %15 = vector.load %arg4[%c0_9, %c0_10] : memref<64x128xf32, #tpu.memory_space<vmem>>, vector<64x128xf32>
      %cst_11 = arith.constant 0.000000e+00 : f32
      %16 = vector.broadcast %cst_11 : f32 to vector<64x128xf32>
      %17 = arith.maximumf %15, %16 : vector<64x128xf32>
      %c0_12 = arith.constant 0 : index
      %c0_13 = arith.constant 0 : index
      %18 = vector.load %arg4[%c0_12, %c0_13] : memref<64x128xf32, #tpu.memory_space<vmem>>, vector<64x128xf32>
      tpu.vector_store %arg4[%c0_12, %c0_13], %17 {strides = array<i32>} : memref<64x128xf32, #tpu.memory_space<vmem>>, vector<64x128xf32>,
    } else {
    }
    return
  }
  func.func @transform_0(%arg0: i32, %arg1: i32) -> (i32, i32) {
    %c0_i32 = arith.constant 0 : i32
    return %arg0, %arg1 : i32, i32
  }
  func.func @transform_1(%arg0: i32, %arg1: i32) -> (i32, i32) {
    %c0_i32 = arith.constant 0 : i32
    %c0_i32_0 = arith.constant 0 : i32
    %c0_i32_1 = arith.constant 0 : i32
    return %c0_i32, %c0_i32_0 : i32, i32
  }
  func.func @transform_2(%arg0: i32, %arg1: i32) -> (i32, i32) {
    %c0_i32 = arith.constant 0 : i32
    %c0_i32_0 = arith.constant 0 : i32
    return %arg0, %c0_i32 : i32, i32
  }
}

</mosaic_0001>

<bundles_post_ra>
// kernel: sage_layer.1
= control target key start
LH: loop header
LB: loop body
LE: loop exit
PB: predicated region body
PF: predicated region fallthrough
CT: control target
= control target key end

     0   :  { %s625_s9 = smov 0   ;;  %s627_s10 = smov 0   ;;  %s723_s0 = inlined_call_operand.vmem [shape: f32[128,128], index: 0, kind: input, shape index: {}]   ;;  %s724_s1 = inlined_call_operand.vmem [shape: f32[128,128], index: 1, kind: input, shape index: {}]   ;;  %s725_s2 = inlined_call_operand.vmem [shape: f32[128,128], index: 2, kind: output, shape index: {}]  }
   0x1   :  { %s629_s11 = smov 0  }
   0x2 LB: > { %s24_s12 = sadd.s32 1, %s604_s10  ;;  %p438_p0 = scmp.ge.s32.totalorder %s608_s11, 1  ;;  %s608_s11 = sphi %s629_s11, %s12_s11   ;;  %s604_s10 = sphi %s627_s10, %s727_s10   ;;  %s600_s9 = sphi %s625_s9, %s726_s9  }
   0x3   : > { %p26_p1 = scmp.ge.s32.totalorder %s24_s12, 2  ;;  %p130_p2 = scmp.lt.s32.totalorder %s608_s11, 3 }
   0x5   : > { %s729_s12 = smov (%p26_p1, %s24_s12), 0  ;;  %p131_p3 = pnand %p438_p0, %p130_p2 }
   0x6   : > { %v200_v0 = vld [vmem:[%s724_s1] sm:$0xff] (!%p131_p3)  ;;  %v201_v1 = vld [vmem:[%s724_s1 + $0x8] sm:$0xff] (!%p131_p3)  ;;  %v202_v2 = vld [vmem:[%s724_s1 + $0x10] sm:$0xff] (!%p131_p3)  ;;  %s439_s19 = sshll.u32 (!%p131_p3), %s600_s9, 3 }
   0x7   : > { %134 = sbr.rel (%p131_p3) target bundleno = 262 (0x106), region = 28  ;;  %v513_v3 = vpack.c.bf16 (!%p131_p3), %v201_v1, %v200_v0  ;;  %v203_v4 = vld [vmem:[%s724_s1 + $0x18] sm:$0xff] (!%p131_p3)  ;;  %p156_p4 = scmp.lt.s32.totalorder (!%p131_p3), %s439_s19, 15  ;;  %v204_v6 = vld [vmem:[%s724_s1 + $0x20] sm:$0xff] (!%p131_p3)  ;;  %v205_v7 = vld [vmem:[%s724_s1 + $0x28] sm:$0xff] (!%p131_p3) }
   0x8   : > { %v517_v5 = vpack.c.bf16 (!%p131_p3), %v203_v4, %v202_v2  ;;  %v521_v8 = vpack.c.bf16 (!%p131_p3), %v205_v7, %v204_v6  ;;  %v206_v9 = vld [vmem:[%s724_s1 + $0x30] sm:$0xff] (!%p131_p3)  ;;  %v207_v10 = vld [vmem:[%s724_s1 + $0x38] sm:$0xff] (!%p131_p3)  ;;  %v208_v14 = vld [vmem:[%s724_s1 + $0x40] sm:$0xff] (!%p131_p3) }
   0x9   : > { %514 = vmatprep.subr.bf16.mxu0 (!%p131_p3), %v513_v3  ;;  %545 = vmatprep.subr.bf16.mxu1 (!%p131_p3), %v513_v3  ;;  %v525_v13 = vpack.c.bf16 (!%p131_p3), %v207_v10, %v206_v9  ;;  %v209_v15 = vld [vmem:[%s724_s1 + $0x48] sm:$0xff] (!%p131_p3)  ;;  %v210_v17 = vld [vmem:[%s724_s1 + $0x50] sm:$0xff] (!%p131_p3)  ;;  %v211_v18 = vld [vmem:[%s724_s1 + $0x58] sm:$0xff] (!%p131_p3) }
   0xa   : > { %516 = vmatpush3.bf16.msra.mxu0 (!%p131_p3), %v513_v3  ;;  %553 = vmatpush3.bf16.msra.mxu1 (!%p131_p3), %v513_v3  ;;  %v529_v16 = vpack.c.bf16 (!%p131_p3), %v209_v15, %v208_v14  ;;  %v533_v19 = vpack.c.bf16 (!%p131_p3), %v211_v18, %v210_v17  ;;  %v212_v20 = vld [vmem:[%s724_s1 + $0x60] sm:$0xff] (!%p131_p3)  ;;  %v213_v21 = vld [vmem:[%s724_s1 + $0x68] sm:$0xff] (!%p131_p3)  ;;  %v214_v23 = vld [vmem:[%s724_s1 + $0x70] sm:$0xff] (!%p131_p3) }
   0xb   : > { %518 = vmatprep.subr.bf16.mxu0 (!%p131_p3), %v517_v5  ;;  %546 = vmatprep.subr.bf16.mxu1 (!%p131_p3), %v517_v5  ;;  %v537_v22 = vpack.c.bf16 (!%p131_p3), %v213_v21, %v212_v20  ;;  %v215_v24 = vld [vmem:[%s724_s1 + $0x78] sm:$0xff] (!%p131_p3) }
   0xc   : > { %v541_v25 = vpack.c.bf16 (!%p131_p3), %v215_v24, %v214_v23 }
   0xe   : > { %s731_s19 = smov (!%p156_p4, %s439_s19), 15  ;;  %520 = vmatpush3.bf16.msra.mxu0 %v517_v5  ;;  %554 = vmatpush3.bf16.msra.mxu1 %v517_v5 }
   0xf   : > { %s440_s26 = sshll.u32 %s731_s19, 3  ;;  %522 = vmatprep.subr.bf16.mxu0 %v521_v8  ;;  %547 = vmatprep.subr.bf16.mxu1 %v521_v8 }
  0x10   : > { %s675_s5 = scalar_lea.vmem %s723_s0, %s440_s26  ;;  %s168_s29 = scalar_lea.vmem %s725_s2, %s440_s26 }
  0x11   : > { %v191_v11 = vld [vmem:[%s675_s5] sm:$0xff]  ;;  %v192_v26 = vld [vmem:[%s675_s5 + $0x8] sm:$0xff]  ;;  %v193_v28 = vld [vmem:[%s675_s5 + $0x10] sm:$0xff] }
  0x12   : > { %v195_v12 = vld [vmem:[%s675_s5 + $0x20] sm:$0xff]  ;;  %501 = vmatprep.mubr.f32.mxu0 %v191_v11  ;;  %524 = vmatpush3.bf16.msra.mxu0 %v521_v8  ;;  %v196_v27 = vld [vmem:[%s675_s5 + $0x28] sm:$0xff]  ;;  %v197_v29 = vld [vmem:[%s675_s5 + $0x30] sm:$0xff] }
  0x13   : > { %507 = vmatprep.mubr.f32.mxu1 %v195_v12  ;;  %555 = vmatpush3.bf16.msra.mxu1 %v521_v8  ;;  %v194_v30 = vld [vmem:[%s675_s5 + $0x18] sm:$0xff] }
  0x14   : > { %526 = vmatprep.subr.bf16.mxu0 %v525_v13  ;;  %548 = vmatprep.subr.bf16.mxu1 %v525_v13  ;;  %v198_v31 = vld [vmem:[%s675_s5 + $0x38] sm:$0xff] }
  0x16   : > { %528 = vmatpush3.bf16.msra.mxu0 %v525_v13 }
  0x17   : > { %556 = vmatpush3.bf16.msra.mxu1 %v525_v13  ;;  %530 = vmatprep.subr.bf16.mxu0 %v529_v16 }
  0x18   : > { %549 = vmatprep.subr.bf16.mxu1 %v529_v16 }
  0x1a   : > { %532 = vmatpush3.bf16.msra.mxu0 %v529_v16 }
  0x1b   : > { %557 = vmatpush3.bf16.msra.mxu1 %v529_v16  ;;  %534 = vmatprep.subr.bf16.mxu0 %v533_v19 }
  0x1c   : > { %550 = vmatprep.subr.bf16.mxu1 %v533_v19 }
  0x1e   : > { %536 = vmatpush3.bf16.msra.mxu0 %v533_v19 }
  0x1f   : > { %558 = vmatpush3.bf16.msra.mxu1 %v533_v19  ;;  %538 = vmatprep.subr.bf16.mxu0 %v537_v22 }
  0x20   : > { %551 = vmatprep.subr.bf16.mxu1 %v537_v22 }
  0x22   : > { %540 = vmatpush3.bf16.msra.mxu0 %v537_v22 }
  0x23   : > { %559 = vmatpush3.bf16.msra.mxu1 %v537_v22  ;;  %542 = vmatprep.subr.bf16.mxu0 %v541_v25 }
  0x24   : > { %552 = vmatprep.subr.bf16.mxu1 %v541_v25 }
  0x26   : > { %544 = vmatpush3.bf16.msra.mxu0 %v541_v25 }
  0x27   : > { %560 = vmatpush3.bf16.msra.mxu1 %v541_v25 }
  0x29   : > { %502 = vmatmul.mubr.f32.vlgmr.msra.gmra.mrb[0].mxu0 %v192_v26 }
  0x2a   : > { %508 = vmatmul.mubr.f32.vlgmr.msra.gmra.mrb[0].mxu1 %v196_v27  ;;  %504 = vmatprep.mubr.f32.mxu0 %v193_v28 }
  0x2b   : > { %510 = vmatprep.mubr.f32.mxu1 %v197_v29 }
  0x2d   : > { %505 = vmatmul.mubr.f32.gmra.mrb[2].mxu0 %v194_v30 }
  0x2e   : > { %511 = vmatmul.mubr.f32.gmra.mrb[2].mxu1 %v198_v31 }
  0xfc   : > { %v503_v32 = vpop.f32.mrb[0].mxu0 }
  0xfd   : > { %v509_v33 = vpop.f32.mrb[0].mxu1  ;;  %v282_v34 = vpop.f32.mrb[1].mxu0  ;;  %v349_v36 = vmax.f32 %v503_v32, 0.0 }
  0xfe   : > { %v302_v35 = vpop.f32.mrb[1].mxu1  ;;  %v353_v37 = vmax.f32 %v509_v33, 0.0  ;;  %v348_v38 = vmax.f32 %v282_v34, 0.0 }
  0xff   : > { %v352_v39 = vmax.f32 %v302_v35, 0.0  ;;  %357 = vst [vmem:[%s168_s29 + $0x8] sm:$0xff] %v349_v36 }
 0x100   : > { %v506_v40 = vpop.f32.mrb[2].mxu0  ;;  %361 = vst [vmem:[%s168_s29 + $0x28] sm:$0xff] %v353_v37  ;;  %356 = vst [vmem:[%s168_s29] sm:$0xff] %v348_v38 }
 0x101   : > { %v512_v41 = vpop.f32.mrb[2].mxu1  ;;  %v292_v42 = vpop.f32.mrb[3].mxu0  ;;  %360 = vst [vmem:[%s168_s29 + $0x20] sm:$0xff] %v352_v39  ;;  %v351_v44 = vmax.f32 %v506_v40, 0.0 }
 0x102   : > { %v312_v43 = vpop.f32.mrb[3].mxu1  ;;  %v355_v45 = vmax.f32 %v512_v41, 0.0  ;;  %v350_v46 = vmax.f32 %v292_v42, 0.0 }
 0x103   : > { %v354_v47 = vmax.f32 %v312_v43, 0.0  ;;  %359 = vst [vmem:[%s168_s29 + $0x18] sm:$0xff] %v351_v44 }
 0x104   : > { %363 = vst [vmem:[%s168_s29 + $0x38] sm:$0xff] %v355_v45  ;;  %358 = vst [vmem:[%s168_s29 + $0x10] sm:$0xff] %v350_v46 }
 0x105   : > { %362 = vst [vmem:[%s168_s29 + $0x30] sm:$0xff] %v354_v47 }
 0x106 PF: > { %s12_s11 = sadd.s32 1, %s608_s11   ;;  %s726_s9 = smov %s604_s10 }
 0x107   : > { %p9_p5 = scmp.ge.s32.totalorder %s12_s11, 4   ;;  %s727_s10 = smov %s729_s12 }
 0x109   :  { %11 = sbr.rel (!%p9_p5) target bundleno = 2 (0x2), region = 67 }

</bundles_post_ra>
